<compile_context>
chip_gen: v5e
topology: v5e:2x2
jax: 0.10.0
libtpu: 0.0.40
codegen_flags: <defaults>
</compile_context>

<pallas_src>
import functools
import math

import jax
import jax.numpy as jnp
from jax.experimental import pallas as pl
from jax.experimental.pallas import tpu as pltpu


def _round_up(x, m):
    return ((x + m - 1) // m) * m


def _pick_tile(dim, candidates):
    """Largest candidate that evenly divides `dim`; else the full dim."""
    for c in candidates:
        if dim % c == 0:
            return c
    return dim


# ----------------------------------------------------------------------------
# Kernel 1: fused QKV projection.  x:(TR, E) @ {Wq,Wk,Wv}:(E, TC) + bias.
# Weights arrive pre-transposed and head-major-permuted (and Wq pre-scaled by
# 1/sqrt(head_dim)), so each output is already in head-contiguous order.
# ----------------------------------------------------------------------------
def _qkv_proj_kernel(x_ref, wq_ref, wk_ref, wv_ref, bq_ref, bk_ref, bv_ref,
                     q_ref, k_ref, v_ref):
    x = x_ref[...]
    q_ref[...] = jnp.dot(x, wq_ref[...], preferred_element_type=jnp.float32) + bq_ref[...]
    k_ref[...] = jnp.dot(x, wk_ref[...], preferred_element_type=jnp.float32) + bk_ref[...]
    v_ref[...] = jnp.dot(x, wv_ref[...], preferred_element_type=jnp.float32) + bv_ref[...]


def qkv_project(x2d, wq_t, wk_t, wv_t, bq, bk, bv, *, max_row_tile=256):
    r, e = x2d.shape

    # Row tile: big (amortize per-step overhead), multiple of 8; pad ragged tail.
    row_tile = min(max_row_tile, _round_up(r, 8))
    rpad = _round_up(r, row_tile)
    if rpad != r:
        x2d = jnp.pad(x2d, ((0, rpad - r), (0, 0)))

    # Column tile over E: bounds resident weight VMEM for large embed dims;
    # falls back to the full width for small E (test shape).
    col_tile = _pick_tile(e, (512, 256, 128)) if e > 512 else e
    grid = (rpad // row_tile, e // col_tile)

    x_spec = pl.BlockSpec((row_tile, e), lambda i, j: (i, 0))
    w_spec = pl.BlockSpec((e, col_tile), lambda i, j: (0, j))
    b_spec = pl.BlockSpec((1, col_tile), lambda i, j: (0, j))
    o_spec = pl.BlockSpec((row_tile, col_tile), lambda i, j: (i, j))
    o_sds = jax.ShapeDtypeStruct((rpad, e), jnp.float32)

    q2d, k2d, v2d = pl.pallas_call(
        _qkv_proj_kernel,
        out_shape=(o_sds, o_sds, o_sds),
        grid=grid,
        in_specs=[x_spec, w_spec, w_spec, w_spec, b_spec, b_spec, b_spec],
        out_specs=(o_spec, o_spec, o_spec),
        compiler_params=pltpu.CompilerParams(
            dimension_semantics=("parallel", "parallel")),
    )(x2d, wq_t, wk_t, wv_t, bq, bk, bv)

    if rpad != r:
        q2d, k2d, v2d = q2d[:r], k2d[:r], v2d[:r]
    return q2d, k2d, v2d


# ----------------------------------------------------------------------------
# Kernel 2: multi-head attention, all heads per grid step, online softmax over
# the kv axis (flash-style).  Output written in the merged (S, H*dv) layout.
# The 1/sqrt(d) scale is already folded into Q (via the projection weights).
# ----------------------------------------------------------------------------
def _attn_kernel(q_ref, k_ref, v_ref, o_ref, m_sc, l_sc, acc_sc, *,
                 heads, v_head_dim):
    ki = pl.program_id(2)

    @pl.when(ki == 0)
    def _init():
        m_sc[...] = jnp.full(m_sc.shape, -jnp.inf, m_sc.dtype)
        l_sc[...] = jnp.zeros(l_sc.shape, l_sc.dtype)
        acc_sc[...] = jnp.zeros(acc_sc.shape, acc_sc.dtype)

    q = q_ref[0]  # (tq, H, dq)  -- pre-scaled by 1/sqrt(dq)
    k = k_ref[0]  # (tk, H, dq)
    v = v_ref[0]  # (tk, H, dv)

    # scores[h, i, j] = <q[i,h,:], k[j,h,:]>: last-axis contraction batched
    # over heads -- no k.T materialized in VMEM, no extra score scaling.
    s = jnp.einsum("qhd,khd->hqk", q, k, preferred_element_type=jnp.float32)

    m_prev = m_sc[...]                                        # (H, tq, 1)
    m_new = jnp.maximum(m_prev, jnp.max(s, axis=-1, keepdims=True))
    alpha = jnp.exp(m_prev - m_new)
    p = jnp.exp(s - m_new)                                    # (H, tq, tk)
    l_sc[...] = alpha * l_sc[...] + jnp.sum(p, axis=-1, keepdims=True)
    acc_sc[...] = alpha * acc_sc[...] + jnp.einsum(
        "hqk,khd->hqd", p, v, preferred_element_type=jnp.float32)
    m_sc[...] = m_new

    @pl.when(ki == pl.num_programs(2) - 1)
    def _finalize():
        # approx=True would route this to the EUP (vrcp) at ~1e-4 rel error;
        # kept exact to match the f32 reference within tight tolerance.
        inv_l = pl.reciprocal(l_sc[...], approx=False)
        out = acc_sc[...] * inv_l                             # (H, tq, dv)
        # Head-contiguous merge straight into the (tq, H*dv) output slab.
        for h in range(heads):
            o_ref[0, :, h * v_head_dim:(h + 1) * v_head_dim] = out[h]


def multihead_attention_pallas(q4, k4, v4):
    # q4/k4/v4: (B, S, H, head_dim) f32, head-contiguous layout.
    b, s, h, dq = q4.shape
    dv = v4.shape[-1]

    t = _pick_tile(s, (512, 256, 128))   # kv/q tile; == S for small/ragged S
    tq = tk = t
    grid = (b, s // tq, s // tk)

    q_spec = pl.BlockSpec((1, tq, h, dq), lambda bi, qi, ki: (bi, qi, 0, 0))
    k_spec = pl.BlockSpec((1, tk, h, dq), lambda bi, qi, ki: (bi, ki, 0, 0))
    v_spec = pl.BlockSpec((1, tk, h, dv), lambda bi, qi, ki: (bi, ki, 0, 0))
    o_spec = pl.BlockSpec((1, tq, h * dv), lambda bi, qi, ki: (bi, qi, 0))

    return pl.pallas_call(
        functools.partial(_attn_kernel, heads=h, v_head_dim=dv),
        out_shape=jax.ShapeDtypeStruct((b, s, h * dv), jnp.float32),
        grid=grid,
        in_specs=[q_spec, k_spec, v_spec],
        out_specs=o_spec,
        scratch_shapes=[
            pltpu.VMEM((h, tq, 1), jnp.float32),    # running max
            pltpu.VMEM((h, tq, 1), jnp.float32),    # running sum
            pltpu.VMEM((h, tq, dv), jnp.float32),   # output accumulator
        ],
        compiler_params=pltpu.CompilerParams(
            dimension_semantics=("parallel", "parallel", "arbitrary")),
    )(q4, k4, v4)


# ----------------------------------------------------------------------------
# SelfAttention forward
# ----------------------------------------------------------------------------
def self_attention_forward(embeddings, w, bias, head_num):
    # embeddings: (B, S, E); w: (3E, E) torch Linear layout; bias: (3E,)
    b, s, e = embeddings.shape
    assert e % head_num == 0
    hd = e // head_num
    inv_scale = 1.0 / math.sqrt(hd)

    # Fold the strided torch head split into the weights: new output feature
    # (h*hd + d) uses old feature (d*H + h).  One-time, weights only.  The
    # attention scale 1/sqrt(hd) is also folded into Wq / bq here.
    perm = jnp.arange(e).reshape(hd, head_num).T.reshape(-1)
    wq_t = jnp.transpose(w[:e][perm]) * inv_scale        # (E, E), head-major cols
    wk_t = jnp.transpose(w[e:2 * e][perm])
    wv_t = jnp.transpose(w[2 * e:][perm])
    bq = (bias[:e][perm] * inv_scale).reshape(1, e)
    bk = bias[e:2 * e][perm].reshape(1, e)
    bv = bias[2 * e:][perm].reshape(1, e)

    q2d, k2d, v2d = qkv_project(embeddings.reshape(b * s, e),
                                wq_t, wk_t, wv_t, bq, bk, bv)

    # Free (contiguous) reshapes -- no transposes.
    q4 = q2d.reshape(b, s, head_num, hd)
    k4 = k2d.reshape(b, s, head_num, hd)
    v4 = v2d.reshape(b, s, head_num, hd)
    return multihead_attention_pallas(q4, k4, v4)   # (B, S, E), merged heads


# Pure-JAX reference mirroring the PyTorch code, for verification.
def _reference(embeddings, w, bias, head_num):
    b, s, e = embeddings.shape
    qkv = embeddings @ w.T + bias
    q, k, v = qkv[..., :e], qkv[..., e:2 * e], qkv[..., 2 * e:]
    hd = e // head_num
    split = lambda t: t.reshape(b, s, hd, head_num).transpose(0, 3, 1, 2)
    mq, mk, mv = split(q), split(k), split(v)
    scores = jnp.einsum("bhqd,bhkd->bhqk", mq, mk) / math.sqrt(hd)
    p = jax.nn.softmax(scores, axis=-1)
    out = jnp.einsum("bhqk,bhkv->bhqv", p, mv)
    return out.transpose(0, 2, 1, 3).reshape(b, s, -1)


if __name__ == "__main__":
    batch, seq, embed_dim, head_num = 2, 8, 32, 4

    key = jax.random.PRNGKey(0)
    kx, kw, kb = jax.random.split(key, 3)
    x = jax.random.normal(kx, (batch, seq, embed_dim), dtype=jnp.float32)
    # nn.Linear(embed_dim, 3*embed_dim): weight (3E, E), bias (3E,)
    bound = 1.0 / math.sqrt(embed_dim)
    w = jax.random.uniform(kw, (3 * embed_dim, embed_dim),
                           minval=-bound, maxval=bound, dtype=jnp.float32)
    bias = jax.random.uniform(kb, (3 * embed_dim,),
                              minval=-bound, maxval=bound, dtype=jnp.float32)

    fwd = jax.jit(self_attention_forward, static_argnums=(3,))
    out = jax.block_until_ready(fwd(x, w, bias, head_num))

    ref = _reference(x, w, bias, head_num)
    assert out.shape == (batch, seq, embed_dim), out.shape
    max_err = float(jnp.max(jnp.abs(out - ref)))
    assert jnp.allclose(out, ref, atol=2e-5, rtol=2e-5), max_err
    print("KERNEL_OK")
</pallas_src>

<mosaic_0001>
module attributes {stable_mosaic.version = 11 : i64} {
  func.func @_attn_kernel(%arg0: i32, %arg1: i32, %arg2: i32, %arg3: memref<1x8x4x8xf32, #tpu.memory_space<vmem>>, %arg4: memref<1x8x4x8xf32, #tpu.memory_space<vmem>>, %arg5: memref<1x8x4x8xf32, #tpu.memory_space<vmem>>, %arg6: memref<1x8x32xf32, #tpu.memory_space<vmem>>, %arg7: memref<4x8x1xf32, #tpu.memory_space<vmem>>, %arg8: memref<4x8x1xf32, #tpu.memory_space<vmem>>, %arg9: memref<4x8x8xf32, #tpu.memory_space<vmem>>) attributes {dimension_semantics = [#tpu.dimension_semantics<parallel>, #tpu.dimension_semantics<parallel>, #tpu.dimension_semantics<arbitrary>], iteration_bounds = array<i64: 2, 1, 1>, scalar_prefetch = 0 : i64, scratch_operands = 3 : i64, tpu.core_type = #tpu.core_type<tc>, window_params = [{transform_indices = @transform_0, window_bounds = array<i64: 1, 8, 4, 8>}, {transform_indices = @transform_1, window_bounds = array<i64: 1, 8, 4, 8>}, {transform_indices = @transform_2, window_bounds = array<i64: 1, 8, 4, 8>}, {transform_indices = @transform_3, window_bounds = array<i64: 1, 8, 32>}]} {
    %c0_i32 = arith.constant 0 : i32
    %0 = arith.cmpi eq, %arg2, %c0_i32 : i32
    %1 = arith.extui %0 : i1 to i32
    %c0_i32_0 = arith.constant 0 : i32
    %2 = arith.cmpi ne, %1, %c0_i32_0 : i32
    scf.if %2 {
      %cst_35 = arith.constant 0xFF800000 : f32
      %35 = vector.broadcast %cst_35 : f32 to vector<4x8x1xf32>
      %c0_36 = arith.constant 0 : index
      %c0_37 = arith.constant 0 : index
      %c0_38 = arith.constant 0 : index
      %36 = vector.load %arg7[%c0_36, %c0_37, %c0_38] : memref<4x8x1xf32, #tpu.memory_space<vmem>>, vector<4x8x1xf32>
      tpu.vector_store %arg7[%c0_36, %c0_37, %c0_38], %35 {strides = array<i32>} : memref<4x8x1xf32, #tpu.memory_space<vmem>>, vector<4x8x1xf32>,
      %cst_39 = arith.constant 0.000000e+00 : f32
      %37 = vector.broadcast %cst_39 : f32 to vector<4x8x1xf32>
      %c0_40 = arith.constant 0 : index
      %c0_41 = arith.constant 0 : index
      %c0_42 = arith.constant 0 : index
      %38 = vector.load %arg8[%c0_40, %c0_41, %c0_42] : memref<4x8x1xf32, #tpu.memory_space<vmem>>, vector<4x8x1xf32>
      tpu.vector_store %arg8[%c0_40, %c0_41, %c0_42], %37 {strides = array<i32>} : memref<4x8x1xf32, #tpu.memory_space<vmem>>, vector<4x8x1xf32>,
      %cst_43 = arith.constant 0.000000e+00 : f32
      %39 = vector.broadcast %cst_43 : f32 to vector<4x8x8xf32>
      %c0_44 = arith.constant 0 : index
      %c0_45 = arith.constant 0 : index
      %c0_46 = arith.constant 0 : index
      %40 = vector.load %arg9[%c0_44, %c0_45, %c0_46] : memref<4x8x8xf32, #tpu.memory_space<vmem>>, vector<4x8x8xf32>
      tpu.vector_store %arg9[%c0_44, %c0_45, %c0_46], %39 {strides = array<i32>} : memref<4x8x8xf32, #tpu.memory_space<vmem>>, vector<4x8x8xf32>,
    } else {
    }
    %c0 = arith.constant 0 : index
    %c0_1 = arith.constant 0 : index
    %c0_2 = arith.constant 0 : index
    %c0_3 = arith.constant 0 : index
    %3 = vector.load %arg3[%c0, %c0_1, %c0_2, %c0_3] : memref<1x8x4x8xf32, #tpu.memory_space<vmem>>, vector<1x8x4x8xf32>
    %4 = vector.shape_cast %3 : vector<1x8x4x8xf32> to vector<8x4x8xf32>
    %c0_4 = arith.constant 0 : index
    %c0_5 = arith.constant 0 : index
    %c0_6 = arith.constant 0 : index
    %c0_7 = arith.constant 0 : index
    %5 = vector.load %arg4[%c0_4, %c0_5, %c0_6, %c0_7] : memref<1x8x4x8xf32, #tpu.memory_space<vmem>>, vector<1x8x4x8xf32>
    %6 = vector.shape_cast %5 : vector<1x8x4x8xf32> to vector<8x4x8xf32>
    %c0_8 = arith.constant 0 : index
    %c0_9 = arith.constant 0 : index
    %c0_10 = arith.constant 0 : index
    %c0_11 = arith.constant 0 : index
    %7 = vector.load %arg5[%c0_8, %c0_9, %c0_10, %c0_11] : memref<1x8x4x8xf32, #tpu.memory_space<vmem>>, vector<1x8x4x8xf32>
    %8 = vector.shape_cast %7 : vector<1x8x4x8xf32> to vector<8x4x8xf32>
    "tpu.trace_start"() <{level = 10 : i32, message = "qhd,khd->hqk"}> : () -> ()
    %cst = arith.constant dense<0.000000e+00> : vector<4x8x8xf32>
    %9 = tpu.matmul %4, %6, %cst {dimension_numbers = #tpu.dot_dimension_numbers<[2], [2], [0], [0], [0, 1, 0, 0, 1, 0], [1], [1]>} : vector<8x4x8xf32>, vector<8x4x8xf32>, vector<4x8x8xf32> -> vector<4x8x8xf32>
    "tpu.trace_stop"() : () -> ()
    %c0_12 = arith.constant 0 : index
    %c0_13 = arith.constant 0 : index
    %c0_14 = arith.constant 0 : index
    %10 = vector.load %arg7[%c0_12, %c0_13, %c0_14] : memref<4x8x1xf32, #tpu.memory_space<vmem>>, vector<4x8x1xf32>
    %cst_15 = arith.constant dense<0xFF800000> : vector<4x8xf32>
    %11 = vector.multi_reduction <maximumf>, %9, %cst_15 [2] : vector<4x8x8xf32> to vector<4x8xf32>
    %12 = vector.shape_cast %11 : vector<4x8xf32> to vector<4x8x1xf32>
    %13 = arith.maximumf %10, %12 : vector<4x8x1xf32>
    %14 = arith.subf %10, %13 : vector<4x8x1xf32>
    %15 = math.exp %14 : vector<4x8x1xf32>
    %16 = vector.broadcast %13 : vector<4x8x1xf32> to vector<4x8x8xf32>
    %17 = arith.subf %9, %16 : vector<4x8x8xf32>
    %18 = math.exp %17 : vector<4x8x8xf32>
    %c0_16 = arith.constant 0 : index
    %c0_17 = arith.constant 0 : index
    %c0_18 = arith.constant 0 : index
    %19 = vector.load %arg8[%c0_16, %c0_17, %c0_18] : memref<4x8x1xf32, #tpu.memory_space<vmem>>, vector<4x8x1xf32>
    %20 = arith.mulf %15, %19 : vector<4x8x1xf32>
    %cst_19 = arith.constant dense<0.000000e+00> : vector<4x8xf32>
    %21 = vector.multi_reduction <add>, %18, %cst_19 [2] : vector<4x8x8xf32> to vector<4x8xf32>
    %22 = vector.shape_cast %21 : vector<4x8xf32> to vector<4x8x1xf32>
    %23 = arith.addf %20, %22 : vector<4x8x1xf32>
    %c0_20 = arith.constant 0 : index
    %c0_21 = arith.constant 0 : index
    %c0_22 = arith.constant 0 : index
    %24 = vector.load %arg8[%c0_20, %c0_21, %c0_22] : memref<4x8x1xf32, #tpu.memory_space<vmem>>, vector<4x8x1xf32>
    tpu.vector_store %arg8[%c0_20, %c0_21, %c0_22], %23 {strides = array<i32>} : memref<4x8x1xf32, #tpu.memory_space<vmem>>, vector<4x8x1xf32>,
    %c0_23 = arith.constant 0 : index
    %c0_24 = arith.constant 0 : index
    %c0_25 = arith.constant 0 : index
    %25 = vector.load %arg9[%c0_23, %c0_24, %c0_25] : memref<4x8x8xf32, #tpu.memory_space<vmem>>, vector<4x8x8xf32>
    %26 = vector.broadcast %15 : vector<4x8x1xf32> to vector<4x8x8xf32>
    %27 = arith.mulf %26, %25 : vector<4x8x8xf32>
    "tpu.trace_start"() <{level = 10 : i32, message = "hqk,khd->hqd"}> : () -> ()
    %cst_26 = arith.constant dense<0.000000e+00> : vector<4x8x8xf32>
    %28 = tpu.matmul %18, %8, %cst_26 {dimension_numbers = #tpu.dot_dimension_numbers<[2], [0], [1], [2], [0, 0, 0, 1, 1, 2], [0], [1]>} : vector<4x8x8xf32>, vector<8x4x8xf32>, vector<4x8x8xf32> -> vector<4x8x8xf32>
    "tpu.trace_stop"() : () -> ()
    %29 = arith.addf %27, %28 : vector<4x8x8xf32>
    %c0_27 = arith.constant 0 : index
    %c0_28 = arith.constant 0 : index
    %c0_29 = arith.constant 0 : index
    %30 = vector.load %arg9[%c0_27, %c0_28, %c0_29] : memref<4x8x8xf32, #tpu.memory_space<vmem>>, vector<4x8x8xf32>
    tpu.vector_store %arg9[%c0_27, %c0_28, %c0_29], %29 {strides = array<i32>} : memref<4x8x8xf32, #tpu.memory_space<vmem>>, vector<4x8x8xf32>,
    %c0_30 = arith.constant 0 : index
    %c0_31 = arith.constant 0 : index
    %c0_32 = arith.constant 0 : index
    %31 = vector.load %arg7[%c0_30, %c0_31, %c0_32] : memref<4x8x1xf32, #tpu.memory_space<vmem>>, vector<4x8x1xf32>
    tpu.vector_store %arg7[%c0_30, %c0_31, %c0_32], %13 {strides = array<i32>} : memref<4x8x1xf32, #tpu.memory_space<vmem>>, vector<4x8x1xf32>,
    %c0_i32_33 = arith.constant 0 : i32
    %32 = arith.cmpi eq, %arg2, %c0_i32_33 : i32
    %33 = arith.extui %32 : i1 to i32
    %c0_i32_34 = arith.constant 0 : i32
    %34 = arith.cmpi ne, %33, %c0_i32_34 : i32
    scf.if %34 {
      %c0_35 = arith.constant 0 : index
      %c0_36 = arith.constant 0 : index
      %c0_37 = arith.constant 0 : index
      %35 = vector.load %arg8[%c0_35, %c0_36, %c0_37] : memref<4x8x1xf32, #tpu.memory_space<vmem>>, vector<4x8x1xf32>
      %36 = tpu.reciprocal %35 : vector<4x8x1xf32> -> vector<4x8x1xf32>
      %c0_38 = arith.constant 0 : index
      %c0_39 = arith.constant 0 : index
      %c0_40 = arith.constant 0 : index
      %37 = vector.load %arg9[%c0_38, %c0_39, %c0_40] : memref<4x8x8xf32, #tpu.memory_space<vmem>>, vector<4x8x8xf32>
      %38 = vector.broadcast %36 : vector<4x8x1xf32> to vector<4x8x8xf32>
      %39 = arith.mulf %37, %38 : vector<4x8x8xf32>
      %40 = vector.extract_strided_slice %39 {offsets = [0, 0, 0], sizes = [1, 8, 8], strides = [1, 1, 1]} : vector<4x8x8xf32> to vector<1x8x8xf32>
      %41 = vector.shape_cast %40 : vector<1x8x8xf32> to vector<8x8xf32>
      %c0_41 = arith.constant 0 : index
      %c0_42 = arith.constant 0 : index
      %c0_43 = arith.constant 0 : index
      %42 = vector.load %arg6[%c0_41, %c0_42, %c0_43] : memref<1x8x32xf32, #tpu.memory_space<vmem>>, vector<1x8x8xf32>
      %43 = vector.shape_cast %42 : vector<1x8x8xf32> to vector<8x8xf32>
      %44 = vector.shape_cast %41 : vector<8x8xf32> to vector<1x8x8xf32>
      tpu.vector_store %arg6[%c0_41, %c0_42, %c0_43], %44 {strides = array<i32>} : memref<1x8x32xf32, #tpu.memory_space<vmem>>, vector<1x8x8xf32>,
      %45 = vector.extract_strided_slice %39 {offsets = [1, 0, 0], sizes = [1, 8, 8], strides = [1, 1, 1]} : vector<4x8x8xf32> to vector<1x8x8xf32>
      %46 = vector.shape_cast %45 : vector<1x8x8xf32> to vector<8x8xf32>
      %c0_44 = arith.constant 0 : index
      %c0_45 = arith.constant 0 : index
      %c8 = arith.constant 8 : index
      %47 = vector.load %arg6[%c0_44, %c0_45, %c8] : memref<1x8x32xf32, #tpu.memory_space<vmem>>, vector<1x8x8xf32>
      %48 = vector.shape_cast %47 : vector<1x8x8xf32> to vector<8x8xf32>
      %49 = vector.shape_cast %46 : vector<8x8xf32> to vector<1x8x8xf32>
      tpu.vector_store %arg6[%c0_44, %c0_45, %c8], %49 {strides = array<i32>} : memref<1x8x32xf32, #tpu.memory_space<vmem>>, vector<1x8x8xf32>,
      %50 = vector.extract_strided_slice %39 {offsets = [2, 0, 0], sizes = [1, 8, 8], strides = [1, 1, 1]} : vector<4x8x8xf32> to vector<1x8x8xf32>
      %51 = vector.shape_cast %50 : vector<1x8x8xf32> to vector<8x8xf32>
      %c0_46 = arith.constant 0 : index
      %c0_47 = arith.constant 0 : index
      %c16 = arith.constant 16 : index
      %52 = vector.load %arg6[%c0_46, %c0_47, %c16] : memref<1x8x32xf32, #tpu.memory_space<vmem>>, vector<1x8x8xf32>
      %53 = vector.shape_cast %52 : vector<1x8x8xf32> to vector<8x8xf32>
      %54 = vector.shape_cast %51 : vector<8x8xf32> to vector<1x8x8xf32>
      tpu.vector_store %arg6[%c0_46, %c0_47, %c16], %54 {strides = array<i32>} : memref<1x8x32xf32, #tpu.memory_space<vmem>>, vector<1x8x8xf32>,
      %55 = vector.extract_strided_slice %39 {offsets = [3, 0, 0], sizes = [1, 8, 8], strides = [1, 1, 1]} : vector<4x8x8xf32> to vector<1x8x8xf32>
      %56 = vector.shape_cast %55 : vector<1x8x8xf32> to vector<8x8xf32>
      %c0_48 = arith.constant 0 : index
      %c0_49 = arith.constant 0 : index
      %c24 = arith.constant 24 : index
      %57 = vector.load %arg6[%c0_48, %c0_49, %c24] : memref<1x8x32xf32, #tpu.memory_space<vmem>>, vector<1x8x8xf32>
      %58 = vector.shape_cast %57 : vector<1x8x8xf32> to vector<8x8xf32>
      %59 = vector.shape_cast %56 : vector<8x8xf32> to vector<1x8x8xf32>
      tpu.vector_store %arg6[%c0_48, %c0_49, %c24], %59 {strides = array<i32>} : memref<1x8x32xf32, #tpu.memory_space<vmem>>, vector<1x8x8xf32>,
    } else {
    }
    return
  }
  func.func @transform_0(%arg0: i32, %arg1: i32, %arg2: i32) -> (i32, i32, i32, i32) {
    %c0_i32 = arith.constant 0 : i32
    %c0_i32_0 = arith.constant 0 : i32
    %c0_i32_1 = arith.constant 0 : i32
    return %arg0, %arg1, %c0_i32, %c0_i32_0 : i32, i32, i32, i32
  }
  func.func @transform_1(%arg0: i32, %arg1: i32, %arg2: i32) -> (i32, i32, i32, i32) {
    %c0_i32 = arith.constant 0 : i32
    %c0_i32_0 = arith.constant 0 : i32
    %c0_i32_1 = arith.constant 0 : i32
    return %arg0, %arg2, %c0_i32, %c0_i32_0 : i32, i32, i32, i32
  }
  func.func @transform_2(%arg0: i32, %arg1: i32, %arg2: i32) -> (i32, i32, i32, i32) {
    %c0_i32 = arith.constant 0 : i32
    %c0_i32_0 = arith.constant 0 : i32
    %c0_i32_1 = arith.constant 0 : i32
    return %arg0, %arg2, %c0_i32, %c0_i32_0 : i32, i32, i32, i32
  }
  func.func @transform_3(%arg0: i32, %arg1: i32, %arg2: i32) -> (i32, i32, i32) {
    %c0_i32 = arith.constant 0 : i32
    %c0_i32_0 = arith.constant 0 : i32
    return %arg0, %arg1, %c0_i32 : i32, i32, i32
  }
}

module attributes {stable_mosaic.version = 11 : i64} {
  func.func @_qkv_proj_kernel(%arg0: i32, %arg1: i32, %arg2: memref<16x32xf32, #tpu.memory_space<vmem>>, %arg3: memref<32x32xf32, #tpu.memory_space<vmem>>, %arg4: memref<32x32xf32, #tpu.memory_space<vmem>>, %arg5: memref<32x32xf32, #tpu.memory_space<vmem>>, %arg6: memref<1x32xf32, #tpu.memory_space<vmem>>, %arg7: memref<1x32xf32, #tpu.memory_space<vmem>>, %arg8: memref<1x32xf32, #tpu.memory_space<vmem>>, %arg9: memref<16x32xf32, #tpu.memory_space<vmem>>, %arg10: memref<16x32xf32, #tpu.memory_space<vmem>>, %arg11: memref<16x32xf32, #tpu.memory_space<vmem>>) attributes {dimension_semantics = [#tpu.dimension_semantics<parallel>, #tpu.dimension_semantics<parallel>], iteration_bounds = array<i64: 1, 1>, scalar_prefetch = 0 : i64, scratch_operands = 0 : i64, tpu.core_type = #tpu.core_type<tc>, window_params = [{transform_indices = @transform_0, window_bounds = array<i64: 16, 32>}, {transform_indices = @transform_1, window_bounds = array<i64: 32, 32>}, {transform_indices = @transform_2, window_bounds = array<i64: 32, 32>}, {transform_indices = @transform_3, window_bounds = array<i64: 32, 32>}, {transform_indices = @transform_4, window_bounds = array<i64: 1, 32>}, {transform_indices = @transform_5, window_bounds = array<i64: 1, 32>}, {transform_indices = @transform_6, window_bounds = array<i64: 1, 32>}, {transform_indices = @transform_7, window_bounds = array<i64: 16, 32>}, {transform_indices = @transform_8, window_bounds = array<i64: 16, 32>}, {transform_indices = @transform_9, window_bounds = array<i64: 16, 32>}]} {
    %c0 = arith.constant 0 : index
    %c0_0 = arith.constant 0 : index
    %0 = vector.load %arg2[%c0, %c0_0] : memref<16x32xf32, #tpu.memory_space<vmem>>, vector<16x32xf32>
    %c0_1 = arith.constant 0 : index
    %c0_2 = arith.constant 0 : index
    %1 = vector.load %arg3[%c0_1, %c0_2] : memref<32x32xf32, #tpu.memory_space<vmem>>, vector<32x32xf32>
    %cst = arith.constant dense<0.000000e+00> : vector<16x32xf32>
    %2 = tpu.matmul %0, %1, %cst {dimension_numbers = #tpu.dot_dimension_numbers<[1], [0], [0], [1], [0, 0, 1, 1], [], []>} : vector<16x32xf32>, vector<32x32xf32>, vector<16x32xf32> -> vector<16x32xf32>
    %c0_3 = arith.constant 0 : index
    %c0_4 = arith.constant 0 : index
    %3 = vector.load %arg6[%c0_3, %c0_4] : memref<1x32xf32, #tpu.memory_space<vmem>>, vector<1x32xf32>
    %4 = vector.broadcast %3 : vector<1x32xf32> to vector<16x32xf32>
    %5 = arith.addf %2, %4 : vector<16x32xf32>
    %c0_5 = arith.constant 0 : index
    %c0_6 = arith.constant 0 : index
    %6 = vector.load %arg9[%c0_5, %c0_6] : memref<16x32xf32, #tpu.memory_space<vmem>>, vector<16x32xf32>
    tpu.vector_store %arg9[%c0_5, %c0_6], %5 {strides = array<i32>} : memref<16x32xf32, #tpu.memory_space<vmem>>, vector<16x32xf32>,
    %c0_7 = arith.constant 0 : index
    %c0_8 = arith.constant 0 : index
    %7 = vector.load %arg4[%c0_7, %c0_8] : memref<32x32xf32, #tpu.memory_space<vmem>>, vector<32x32xf32>
    %cst_9 = arith.constant dense<0.000000e+00> : vector<16x32xf32>
    %8 = tpu.matmul %0, %7, %cst_9 {dimension_numbers = #tpu.dot_dimension_numbers<[1], [0], [0], [1], [0, 0, 1, 1], [], []>} : vector<16x32xf32>, vector<32x32xf32>, vector<16x32xf32> -> vector<16x32xf32>
    %c0_10 = arith.constant 0 : index
    %c0_11 = arith.constant 0 : index
    %9 = vector.load %arg7[%c0_10, %c0_11] : memref<1x32xf32, #tpu.memory_space<vmem>>, vector<1x32xf32>
    %10 = vector.broadcast %9 : vector<1x32xf32> to vector<16x32xf32>
    %11 = arith.addf %8, %10 : vector<16x32xf32>
    %c0_12 = arith.constant 0 : index
    %c0_13 = arith.constant 0 : index
    %12 = vector.load %arg10[%c0_12, %c0_13] : memref<16x32xf32, #tpu.memory_space<vmem>>, vector<16x32xf32>
    tpu.vector_store %arg10[%c0_12, %c0_13], %11 {strides = array<i32>} : memref<16x32xf32, #tpu.memory_space<vmem>>, vector<16x32xf32>,
    %c0_14 = arith.constant 0 : index
    %c0_15 = arith.constant 0 : index
    %13 = vector.load %arg5[%c0_14, %c0_15] : memref<32x32xf32, #tpu.memory_space<vmem>>, vector<32x32xf32>
    %cst_16 = arith.constant dense<0.000000e+00> : vector<16x32xf32>
    %14 = tpu.matmul %0, %13, %cst_16 {dimension_numbers = #tpu.dot_dimension_numbers<[1], [0], [0], [1], [0, 0, 1, 1], [], []>} : vector<16x32xf32>, vector<32x32xf32>, vector<16x32xf32> -> vector<16x32xf32>
    %c0_17 = arith.constant 0 : index
    %c0_18 = arith.constant 0 : index
    %15 = vector.load %arg8[%c0_17, %c0_18] : memref<1x32xf32, #tpu.memory_space<vmem>>, vector<1x32xf32>
    %16 = vector.broadcast %15 : vector<1x32xf32> to vector<16x32xf32>
    %17 = arith.addf %14, %16 : vector<16x32xf32>
    %c0_19 = arith.constant 0 : index
    %c0_20 = arith.constant 0 : index
    %18 = vector.load %arg11[%c0_19, %c0_20] : memref<16x32xf32, #tpu.memory_space<vmem>>, vector<16x32xf32>
    tpu.vector_store %arg11[%c0_19, %c0_20], %17 {strides = array<i32>} : memref<16x32xf32, #tpu.memory_space<vmem>>, vector<16x32xf32>,
    return
  }
  func.func @transform_0(%arg0: i32, %arg1: i32) -> (i32, i32) {
    %c0_i32 = arith.constant 0 : i32
    %c0_i32_0 = arith.constant 0 : i32
    return %arg0, %c0_i32 : i32, i32
  }
  func.func @transform_1(%arg0: i32, %arg1: i32) -> (i32, i32) {
    %c0_i32 = arith.constant 0 : i32
    %c0_i32_0 = arith.constant 0 : i32
    return %c0_i32, %arg1 : i32, i32
  }
  func.func @transform_2(%arg0: i32, %arg1: i32) -> (i32, i32) {
    %c0_i32 = arith.constant 0 : i32
    %c0_i32_0 = arith.constant 0 : i32
    return %c0_i32, %arg1 : i32, i32
  }
  func.func @transform_3(%arg0: i32, %arg1: i32) -> (i32, i32) {
    %c0_i32 = arith.constant 0 : i32
    %c0_i32_0 = arith.constant 0 : i32
    return %c0_i32, %arg1 : i32, i32
  }
  func.func @transform_4(%arg0: i32, %arg1: i32) -> (i32, i32) {
    %c0_i32 = arith.constant 0 : i32
    %c0_i32_0 = arith.constant 0 : i32
    return %c0_i32, %arg1 : i32, i32
  }
  func.func @transform_5(%arg0: i32, %arg1: i32) -> (i32, i32) {
    %c0_i32 = arith.constant 0 : i32
    %c0_i32_0 = arith.constant 0 : i32
    return %c0_i32, %arg1 : i32, i32
  }
  func.func @transform_6(%arg0: i32, %arg1: i32) -> (i32, i32) {
    %c0_i32 = arith.constant 0 : i32
    %c0_i32_0 = arith.constant 0 : i32
    return %c0_i32, %arg1 : i32, i32
  }
  func.func @transform_7(%arg0: i32, %arg1: i32) -> (i32, i32) {
    %c0_i32 = arith.constant 0 : i32
    return %arg0, %arg1 : i32, i32
  }
  func.func @transform_8(%arg0: i32, %arg1: i32) -> (i32, i32) {
    %c0_i32 = arith.constant 0 : i32
    return %arg0, %arg1 : i32, i32
  }
  func.func @transform_9(%arg0: i32, %arg1: i32) -> (i32, i32) {
    %c0_i32 = arith.constant 0 : i32
    return %arg0, %arg1 : i32, i32
  }
}

</mosaic_0001>

<bundles_post_ra>
// kernel: self_attention_forward.2
= control target key start
LH: loop header
LB: loop body
LE: loop exit
PB: predicated region body
PF: predicated region fallthrough
CT: control target
= control target key end

     0   :  { %vm39_vm0 = vcmask 261120   ;;  %s293_s3 = inlined_call_operand.vmem [shape: f32[32,32], index: 3, kind: input, shape index: {}]   ;;  %s294_s2 = inlined_call_operand.vmem [shape: f32[32,32], index: 2, kind: input, shape index: {}]   ;;  %s295_s1 = inlined_call_operand.vmem [shape: f32[32,32], index: 1, kind: input, shape index: {}]   ;;  %s296_s0 = inlined_call_operand.vmem [shape: f32[16,32], index: 0, kind: input, shape index: {}]   ;;  %s297_s5 = inlined_call_operand.vmem [shape: f32[1,32], index: 5, kind: input, shape index: {}]   ;;  %s298_s6 = inlined_call_operand.vmem [shape: f32[1,32], index: 6, kind: input, shape index: {}]   ;;  %s299_s4 = inlined_call_operand.vmem [shape: f32[1,32], index: 4, kind: input, shape index: {}]   ;;  %s300_s8 = inlined_call_operand.vmem [shape: f32[16,32], index: 8, kind: output, shape index: {1}]   ;;  %s301_s7 = inlined_call_operand.vmem [shape: f32[16,32], index: 7, kind: output, shape index: {0}]   ;;  %s302_s9 = inlined_call_operand.vmem [shape: f32[16,32], index: 9, kind: output, shape index: {2}]  }
   0x1   :  { %v107_v0 = vld [vmem:[%s293_s3 + $0x18] sm:$0xff]  ;;  %v106_v1 = vld [vmem:[%s293_s3 + $0x10] sm:$0xff]  ;;  %v105_v2 = vld [vmem:[%s293_s3 + $0x8] sm:$0xff] }
   0x2   :  { %124 = vmatpush.msra.mxu2 %v107_v0  ;;  %v74_v3 = vld [vmem:[%s294_s2 + $0x18] sm:$0xff]  ;;  %v73_v5 = vld [vmem:[%s294_s2 + $0x10] sm:$0xff]  ;;  %v72_v7 = vld [vmem:[%s294_s2 + $0x8] sm:$0xff] }
   0x3   :  { %91 = vmatpush.msra.mxu1 %v74_v3  ;;  %v34_v4 = vld [vmem:[%s295_s1 + $0x18] sm:$0xff]  ;;  %v33_v6 = vld [vmem:[%s295_s1 + $0x10] sm:$0xff]  ;;  %v104_v8 = vld [vmem:[%s293_s3] sm:$0xff] }
   0x4   :  { %125 = vmatpush.msra.mxu2 %v106_v1  ;;  %155 = vmatpush.msra.mxu3 %v34_v4  ;;  %v32_v9 = vld [vmem:[%s295_s1 + $0x8] sm:$0xff]  ;;  %v29_v10 = vld [vmem:[%s296_s0] sm:$0xff] }
   0x5   :  { %92 = vmatpush.msra.mxu1 %v73_v5  ;;  %58 = vmatpush.msra.mxu0 %v34_v4  ;;  %v71_v11 = vld [vmem:[%s294_s2] sm:$0xff]  ;;  %v30_v13 = vld [vmem:[%s296_s0 + $0x8] sm:$0xff] }
   0x6   :  { %126 = vmatpush.msra.mxu2 %v105_v2  ;;  %156 = vmatpush.msra.mxu3 %v33_v6  ;;  %v31_v12 = vld [vmem:[%s295_s1] sm:$0xff] }
   0x7   :  { %93 = vmatpush.msra.mxu1 %v72_v7  ;;  %59 = vmatpush.msra.mxu0 %v33_v6  ;;  %v159_v14 = vld [vmem:[%s297_s5] ss:$0 sm:$0xff] }
   0x8   :  { %127 = vmatpush.msra.mxu2 %v104_v8  ;;  %157 = vmatpush.msra.mxu3 %v32_v9  ;;  %v161_v17 = vld [vmem:[%s299_s4] ss:$0 sm:$0xff] }
   0x9   :  { %153 = vmatmul.msk.f32.vlgmr.msra.gmra.mxu2 %vm39_vm0, %v29_v10  ;;  %94 = vmatpush.msra.mxu1 %v71_v11  ;;  %v160_v18 = vld [vmem:[%s298_s6] ss:$0 sm:$0xff] }
   0xa   :  { %151 = vmatmul.msk.f32.vlgmr.msra.gmra.mxu1 %vm39_vm0, %v29_v10  ;;  %158 = vmatpush.msra.mxu3 %v31_v12 }
   0xb   :  { %150 = vmatmul.msk.f32.vlgmr.msra.gmra.mxu3 %vm39_vm0, %v30_v13  ;;  %60 = vmatpush.msra.mxu0 %v32_v9 }
   0xd   :  { %61 = vmatpush.msra.mxu0 %v31_v12 }
   0xe   :  { %149 = vmatmul.msk.f32.vlgmr.msra.gmra.mxu0 %vm39_vm0, %v29_v10 }
  0x11   :  { %154 = vmatmul.msk.f32.gmra.mxu2 %vm39_vm0, %v30_v13 }
  0x12   :  { %152 = vmatmul.msk.f32.gmra.mxu1 %vm39_vm0, %v30_v13 }
  0x87   :  { %v96_v15 = vpop.f32.mrf.mxu1 }
  0x88   :  { %v97_v16 = vadd.f32 %v159_v14, %v96_v15 }
  0x8a   :  { %102 = vst.msk [vmem:[%s300_s8] sm:$0xff] %vm39_vm0, %v97_v16 }
  0x8b   :  { %v63_v19 = vpop.f32.mrf.mxu0 }
  0x8c   :  { %v129_v20 = vpop.f32.mrf.mxu2  ;;  %v64_v21 = vadd.f32 %v161_v17, %v63_v19 }
  0x8d   :  { %v130_v22 = vadd.f32 %v160_v18, %v129_v20 }
  0x8e   :  { %69 = vst.msk [vmem:[%s301_s7] sm:$0xff] %vm39_vm0, %v64_v21  ;;  %v66_v23 = vpop.f32.mrf.mxu3 }
  0x8f   :  { %135 = vst.msk [vmem:[%s302_s9] sm:$0xff] %vm39_vm0, %v130_v22  ;;  %v67_v24 = vadd.f32 %v161_v17, %v66_v23  ;;  %v99_v25 = vpop.f32.mrf.mxu1 }
  0x90   :  { %v100_v26 = vadd.f32 %v159_v14, %v99_v25 }
  0x91   :  { %70 = vst.msk [vmem:[%s301_s7 + $0x8] sm:$0xff] %vm39_vm0, %v67_v24 }
  0x92   :  { %103 = vst.msk [vmem:[%s300_s8 + $0x8] sm:$0xff] %vm39_vm0, %v100_v26 }
  0x94   :  { %v132_v27 = vpop.f32.mrf.mxu2 }
  0x95   :  { %v133_v28 = vadd.f32 %v160_v18, %v132_v27 }
  0x97   :  { %136 = vst.msk [vmem:[%s302_s9 + $0x8] sm:$0xff] %vm39_vm0, %v133_v28 }

// kernel: self_attention_forward.3
= control target key start
LH: loop header
LB: loop body
LE: loop exit
PB: predicated region body
PF: predicated region fallthrough
CT: control target
= control target key end

     0   :  { %8 = vsyncpa [#allocation6], 0  ;;  %s2273_s0 = inlined_call_operand.vmem [shape: f32[2,8,4,8], index: 0, kind: input, shape index: {}]   ;;  %s2274_s1 = inlined_call_operand.vmem [shape: f32[2,8,4,8], index: 1, kind: input, shape index: {}]   ;;  %s2275_s2 = inlined_call_operand.vmem [shape: f32[2,8,4,8], index: 2, kind: input, shape index: {}]   ;;  %s2276_s3 = inlined_call_operand.hbm [shape: f32[2,8,32], index: 3, kind: output, shape index: {}]  }
   0x1   :  { %10 = vsyncpa [#allocation6 + $0x1], 0  ;;  %s1952_s12 = smov 0   ;;  %s1954_s13 = smov 0  }
   0x2   :  { %s1956_s14 = smov 0   ;;  %s1958_s15 = smov 0  }
   0x3   :  { %s1960_s16 = smov 0   ;;  %s1962_s17 = smov 0  }
   0x4 LB: > { %s1671_s18 = sadd.s32 4294967295, %s1922_s17   ;;  %s1672_s19 = sadd.s32 4294967294, %s1922_s17   ;;  %s1922_s17 = sphi %s1962_s17, %s16_s17   ;;  %s1918_s16 = sphi %s1960_s16, %s2283_s16   ;;  %s1914_s15 = sphi %s1958_s15, %s2282_s15   ;;  %s1910_s14 = sphi %s1956_s14, %s2281_s14   ;;  %s1906_s13 = sphi %s1954_s13, %s2280_s13   ;;  %s1902_s12 = sphi %s1952_s12, %s2279_s12  }
   0x5   : > { %s35_s20 = sadd.s32 1, %s1918_s16  ;;  %s128_s21 = sadd.s32 1, %s1910_s14 }
   0x6   : > { %p37_p0 = scmp.ge.s32.totalorder %s35_s20, 2  ;;  %p138_p1 = scmp.ne.s32.totalorder %s1910_s14, %s1906_s13 }
   0x7   : > { %p139_p2 = scmp.eq.s32.totalorder %s1671_s18, 1  ;;  %p144_p3 = scmp.ne.s32.totalorder %s1906_s13, %s1902_s12 }
   0x8   : > { %s2285_s20 = smov (%p37_p0, %s35_s20), 0  ;;  %p145_p5 = scmp.eq.s32.totalorder %s1672_s19, 1 }
   0x9   : > { %p1992_p4 = por %p139_p2, %p138_p1  ;;  %s123_s23 = ssub.s32 %s1918_s16, %s2285_s20 }
   0xa   : > { %p1675_p6 = scmp.ge.s32.totalorder %s1922_s17, 1  ;;  %p126_p7 = scmp.eq.s32.totalorder %s123_s23, 0 }
   0xb   : > { %p1999_p8 = por %p145_p5, %p144_p3  ;;  %p202_p9 = scmp.lt.s32.totalorder %s1922_s17, 3 }
   0xc   : > { %s2005_s25 = scalar_select %p126_p7, %s1910_s14, %s128_s21  }
   0xd   : > { %p203_p10 = pnand %p1675_p6, %p202_p9 }
   0xe   : > { %p249_p11 = scmp.lt.s32.totalorder (!%p203_p10), %s1914_s15, 1  ;;  %s1929_s10 = smov (!%p203_p10), 8  }
   0xf   : > { %206 = sbr.rel (%p203_p10) target bundleno = 1155 (0x483), region = 32  ;;  %s1930_s11 = smov (!%p203_p10), 24  }
  0x10   : > { %s1931_s18 = smov (!%p203_p10), 16   ;;  %s245_s19 = sand.u32 (!%p203_p10), 1, %s1906_s13  }
  0x11   : > { %s1676_s21 = sshll.u32 (!%p203_p10), %s245_s19, 3  ;;  %s1542_s5 = scalar_lea.sflag (!%p203_p10), [#allocation6], %s245_s19 }
  0x12   : > { %s247_s23 = scalar_lea.vmem (!%p203_p10), [#allocation5], %s1676_s21 }
  0x14   : > { %s250_s26 = scalar_select %p249_p11, %s1914_s15, 1  ;;  %v1924_v12 = vmov 1983009808   ;;  %vm321_vm0 = vcmask 1047556   ;;  %v1925_v20 = vmov 1934713408  }
  0x15   : > { %v324_v13 = vunpack.c.l.s4 %v1924_v12  ;;  %v350_v21 = vunpack.c.l.s4 %v1925_v20  ;;  %vm291_vm1 = vcmask 64512   ;;  %vm282_vm2 = vcmask 7168  }
  0x16   : > { %s2009_s27 = sshll.u32 %s250_s26, 5  ;;  %s1692_s26 = sshll.u32 %s1914_s15, 3 }
  0x17   : > { %s266_s30 = scalar_lea.vmem %s2274_s1, %s2009_s27  ;;  %v2015_v22 = vunpack.c.0.s8 %v324_v13  ;;  %v2019_v27 = vunpack.c.0.s8 %v350_v21  ;;  %s256_s6 = scalar_lea.vmem %s2273_s0, %s2009_s27 }
  0x18   : > { %v308_v0 = vld [vmem:[%s266_s30 + $0x10] sm:$0xf]  ;;  %v310_v1 = vld [vmem:[%s266_s30 + $0x18] sm:$0xf]  ;;  %v306_v2 = vld [vmem:[%s266_s30 + $0x8] sm:$0xf]  ;;  %s276_s9 = scalar_lea.vmem %s2275_s2, %s2009_s27  ;;  %s1553_s29 = scalar_lea.hbm %s2276_s3, %s1692_s26 }
  0x19   : > { %v1761_v3 = vpack.i.bf16 %v310_v1, %v308_v0  ;;  %v311_v4 = vld [vmem:[%s266_s30 + $0x1c] sm:$0xf]  ;;  %v304_v6 = vld [vmem:[%s266_s30] sm:$0xf]  ;;  %v309_v7 = vld [vmem:[%s266_s30 + $0x14] sm:$0xf] }
  0x1a   : > { %v1775_v5 = vpack.i.bf16 %v311_v4, %v306_v2  ;;  %v305_v8 = vld [vmem:[%s266_s30 + $0x4] sm:$0xf]  ;;  %v307_v9 = vld [vmem:[%s266_s30 + $0xc] sm:$0xf]  ;;  %v1768_v10 = vpack.i.bf16 %v309_v7, %v304_v6  ;;  %s1555_s30 = sshll.u32 %s247_s23, 4  ;;  %s1557_s4 = sshll.u32 %s1553_s29, 4  ;;  %s1556_s30 = int_to_ptr.vmem [resolvable:$true] %s1555_s30  ;;  %s1558_s4 = int_to_ptr.hbm [resolvable:$true] %s1557_s4 }
  0x1b   : > { %1762 = vxpose.xlu0.b32.start.end [1/1] (short) (narrow) %v1761_v3, 8  ;;  %v1782_v11 = vpack.i.bf16 %v307_v9, %v305_v8 }
  0x1c   : > { %1776 = vxpose.xlu1.b32.start.end [1/1] (short) (narrow) %v1775_v5, 8 }
  0x23   : > { %1769 = vxpose.xlu0.b32.start.end [1/1] (short) (narrow) %v1768_v10, 8 }
  0x24   : > { %1783 = vxpose.xlu1.b32.start.end [1/1] (short) (narrow) %v1782_v11, 8 }
  0xbf   : > { %v1763_v14 = vpop.trf.xlu0 }
  0xc0   : > { %v1767_v15 = vunpack.i.h.bf16 %v1763_v14  ;;  %v1764_v16 = vunpack.i.l.bf16 %v1763_v14  ;;  %v1777_v17 = vpop.trf.xlu1 }
  0xc1   : > { %v1781_v23 = vunpack.i.h.bf16 %v1777_v17  ;;  %v1778_v24 = vunpack.i.l.bf16 %v1777_v17 }
  0xc2   : > { %v657_v18 = vrot.slane %v1767_v15, 4  ;;  %v659_v19 = vrot.slane %v1764_v16, 4 }
  0xc3   : > { %v669_v30 = vrot.slane %v1781_v23, 4  ;;  %v633_v31 = vrot.slane %v1778_v24, 4 }
  0xc4   : > { %v658_v25 = vsel %vm321_vm0, %v657_v18, %v1764_v16  ;;  %v660_v26 = vsel %vm321_vm0, %v1767_v15, %v659_v19 }
  0xc5   : > { %v664_v28 = vperm.slane %v658_v25, %v2015_v22  ;;  %v668_v29 = vperm.slane %v660_v26, %v2015_v22 }
  0xc7   : > { %v1770_v32 = vpop.trf.xlu0  ;;  %v707_v48 = vrot.slane %v664_v28, 4  ;;  %v719_v49 = vrot.slane %v668_v29, 4 }
  0xc8   : > { %v1784_v33 = vpop.trf.xlu1  ;;  %v1774_v34 = vunpack.i.h.bf16 %v1770_v32  ;;  %v1771_v35 = vunpack.i.l.bf16 %v1770_v32 }
  0xc9   : > { %v1788_v36 = vunpack.i.h.bf16 %v1784_v33  ;;  %v1785_v37 = vunpack.i.l.bf16 %v1784_v33 }
  0xca   : > { %v670_v38 = vsel %vm321_vm0, %v669_v30, %v1774_v34  ;;  %v671_v39 = vrot.slane %v1774_v34, 4  ;;  %v634_v40 = vsel %vm321_vm0, %v633_v31, %v1771_v35  ;;  %v635_v41 = vrot.slane %v1771_v35, 4 }
  0xcb   : > { %v645_v42 = vrot.slane %v1788_v36, 4  ;;  %v647_v43 = vrot.slane %v1785_v37, 4  ;;  %v676_v44 = vperm.slane %v670_v38, %v2015_v22  ;;  %v640_v45 = vperm.slane %v634_v40, %v2015_v22  ;;  %v302_v38 = vld [vmem:[%s256_s6 + $0x18] sm:$0xf]  ;;  %v296_v40 = vld [vmem:[%s256_s6] sm:$0xf] }
  0xcc   : > { %v672_v46 = vsel %vm321_vm0, %v1781_v23, %v671_v39  ;;  %v636_v47 = vsel %vm321_vm0, %v1778_v24, %v635_v41 }
  0xcd   : > { %v646_v50 = vsel %vm321_vm0, %v645_v42, %v1785_v37  ;;  %v648_v51 = vsel %vm321_vm0, %v1788_v36, %v647_v43  ;;  %v705_v52 = vrot.slane %v676_v44, 4  ;;  %v644_v53 = vperm.slane %v636_v47, %v2015_v22  ;;  %v298_v36 = vld [vmem:[%s256_s6 + $0x8] sm:$0xf]  ;;  %v299_v37 = vld [vmem:[%s256_s6 + $0xc] sm:$0xf] }
  0xce   : > { %v652_v54 = vperm.slane %v646_v50, %v2015_v22  ;;  %v656_v55 = vperm.slane %v648_v51, %v2015_v22  ;;  %v680_v56 = vperm.slane %v672_v46, %v2015_v22  ;;  %v683_v57 = vrot.slane %v640_v45, 4  ;;  %v303_v46 = vld [vmem:[%s256_s6 + $0x1c] sm:$0xf]  ;;  %v301_v51 = vld [vmem:[%s256_s6 + $0x14] sm:$0xf] }
  0xcf   : > { %v695_v58 = vrot.slane %v644_v53, 4  ;;  %v708_v59 = vsel %vm321_vm0, %v676_v44, %v707_v48  ;;  %v706_v60 = vsel %vm321_vm0, %v705_v52, %v664_v28  ;;  %v320_v39 = vrot.slane %v298_v36, 4  ;;  %v297_v44 = vld [vmem:[%s256_s6 + $0x4] sm:$0xf] }
  0xd0   : > { %v684_v61 = vsel %vm321_vm0, %v652_v54, %v683_v57  ;;  %v693_v62 = vrot.slane %v656_v55, 4  ;;  %v716_v63 = vperm.slane %v708_v59, %v2019_v27  ;;  %v720_v0 = vsel %vm321_vm0, %v680_v56, %v719_v49 }
  0xd1   : > { %v692_v1 = vperm.slane %v684_v61, %v2019_v27  ;;  %v696_v2 = vsel %vm321_vm0, %v656_v55, %v695_v58  ;;  %v728_v3 = vperm.slane %v720_v0, %v2019_v27  ;;  %v681_v4 = vrot.slane %v652_v54, 4 }
  0xd2   : > { %v704_v5 = vperm.slane %v696_v2, %v2019_v27  ;;  %v733_v6 = vrot.slane %v716_v63, 4  ;;  %v712_v7 = vperm.slane %v706_v60, %v2019_v27  ;;  %v694_v8 = vsel %vm321_vm0, %v693_v62, %v644_v53 }
  0xd3   : > { %v741_v9 = vrot.slane %v728_v3, 4  ;;  %v682_v10 = vsel %vm321_vm0, %v681_v4, %v640_v45  ;;  %v735_v11 = vrot.slane %v692_v1, 4  ;;  %v700_v12 = vperm.slane %v694_v8, %v2019_v27  ;;  %v300_v45 = vld [vmem:[%s256_s6 + $0x10] sm:$0xf]  ;;  %s1858_s6 = sshra.s32 %s1558_s4, 4  ;;  %s1859_s6 = int_to_ptr.hbm [resolvable:$true] %s1858_s6 }
  0xd4   : > { %v688_v13 = vperm.slane %v682_v10, %v2019_v27  ;;  %v729_v14 = vrot.slane %v712_v7, 4  ;;  %v717_v15 = vrot.slane %v680_v56, 4  ;;  %v734_v16 = vsel %vm321_vm0, %v733_v6, %v692_v1  ;;  %s1860_s7 = scalar_lea.hbm %s1859_s6, 8  ;;  %p1865_p1 = scmp.lt.s32.totalorder %s1859_s6, %s2276_s3 }
  0xd5   : > { %v742_v17 = vsel %vm321_vm0, %v741_v9, %v704_v5  ;;  %v736_v18 = vsel %vm321_vm0, %v716_v63, %v735_v11  ;;  %v739_v19 = vrot.slane %v700_v12, 4  ;;  %v743_v28 = vrot.slane %v704_v5, 4  ;;  %p1861_p12 = scmp.ne.s32.totalorder %s1859_s6, %s1860_s7 }
  0xd6   : > { %v1789_v20 = vpack.i.bf16 %v734_v16, %v742_v17  ;;  %v730_v21 = vsel %vm321_vm0, %v729_v14, %v688_v13  ;;  %v718_v23 = vsel %vm321_vm0, %v717_v15, %v668_v29  ;;  %v731_v24 = vrot.slane %v688_v13, 4 }
  0xd7   : > { %v1803_v25 = vpack.i.bf16 %v736_v18, %v730_v21  ;;  %v724_v26 = vperm.slane %v718_v23, %v2019_v27  ;;  %v744_v35 = vsel %vm321_vm0, %v728_v3, %v743_v28  ;;  %v327_v41 = vrot.slane %v299_v37, 4  ;;  %p1862_p13 = pnand %p1861_p12, %p1992_p4 }
  0xd8   : > { %1790 = vxpose.xlu2.b32.start.end [1/1] (short) (narrow) %v1789_v20, 8  ;;  %v732_v30 = vsel %vm321_vm0, %v712_v7, %v731_v24  ;;  %v333_v42 = vrot.slane %v302_v38, 4  ;;  %v322_v47 = vsel %vm321_vm0, %v320_v39, %v296_v40  ;;  %v339_v50 = vrot.slane %v303_v46, 4 }
  0xd9   : > { %1804 = vxpose.xlu0.b32.start.end [1/1] (short) (narrow) %v1803_v25, 8  ;;  %v740_v31 = vsel %vm321_vm0, %v724_v26, %v739_v19  ;;  %v737_v32 = vrot.slane %v724_v26, 4  ;;  %v328_v48 = vsel %vm321_vm0, %v327_v41, %v297_v44  ;;  %v326_v52 = vperm.slane %v322_v47, %v2015_v22  ;;  %p1863_p0 = pneg %p1862_p13 }
  0xda   : > { %v1810_v33 = vpack.i.bf16 %v732_v30, %v740_v31  ;;  %v334_v49 = vsel %vm321_vm0, %v333_v42, %v300_v45  ;;  %v332_v54 = vperm.slane %v328_v48, %v2015_v22  ;;  %v340_v56 = vsel %vm321_vm0, %v339_v50, %v301_v51 }
  0xdb   : > { %v738_v34 = vsel %vm321_vm0, %v737_v32, %v700_v12  ;;  %v338_v55 = vperm.slane %v334_v49, %v2015_v22  ;;  %v347_v60 = vrot.slane %v326_v52, 4  ;;  %v344_v62 = vperm.slane %v340_v56, %v2015_v22 }
  0xdc   : > { %1811 = vxpose.xlu1.b32.start.end [1/1] (short) (narrow) %v1810_v33, 8  ;;  %v1796_v29 = vpack.i.bf16 %v744_v35, %v738_v34  ;;  %v345_v0 = vrot.slane %v332_v54, 4 }
  0xdd   : > { %v359_v63 = vrot.slane %v338_v55, 4  ;;  %v348_v7 = vsel %vm321_vm0, %v332_v54, %v347_v60  ;;  %v357_v10 = vrot.slane %v344_v62, 4 }
  0xde   : > { %v346_v9 = vsel %vm321_vm0, %v345_v0, %v326_v52  ;;  %v356_v19 = vperm.slane %v348_v7, %v2019_v27 }
  0xdf   : > { %v360_v8 = vsel %vm321_vm0, %v344_v62, %v359_v63  ;;  %v352_v26 = vperm.slane %v346_v9, %v2019_v27  ;;  %v358_v28 = vsel %vm321_vm0, %v357_v10, %v338_v55 }
  0xe0   : > { %1797 = vxpose.xlu2.b32.start.end [1/1] (short) (narrow) %v1796_v29, 8  ;;  %v368_v20 = vperm.slane %v360_v8, %v2019_v27  ;;  %v375_v34 = vrot.slane %v356_v19, 4  ;;  %v364_v38 = vperm.slane %v358_v28, %v2019_v27 }
  0xe1   : > { %v371_v41 = vrot.slane %v352_v26, 4 }
  0xe2   : > { %v373_v33 = vrot.slane %v368_v20, 4  ;;  %v369_v45 = vrot.slane %v364_v38, 4  ;;  %v376_v47 = vsel %vm321_vm0, %v368_v20, %v375_v34  ;;  %v318_v34 = vld [vmem:[%s276_s9 + $0x18] sm:$0xf] }
  0xe3   : > { %v372_v54 = vsel %vm321_vm0, %v364_v38, %v371_v41  ;;  %v316_v38 = vld [vmem:[%s276_s9 + $0x10] sm:$0xf] }
  0xe4   : > { %v374_v50 = vsel %vm321_vm0, %v373_v33, %v356_v19  ;;  %v370_v56 = vsel %vm321_vm0, %v369_v45, %v352_v26  ;;  %v319_v26 = vld [vmem:[%s276_s9 + $0x1c] sm:$0xf]  ;;  %v317_v33 = vld [vmem:[%s276_s9 + $0x14] sm:$0xf] }
 0x171   : > { %v1791_v43 = vpop.trf.xlu2 }
 0x172   : > { %v1792_v53 = vunpack.i.l.bf16 %v1791_v43  ;;  %v1795_v57 = vunpack.i.h.bf16 %v1791_v43 }
 0x174   : > { %v1013_v61 = vrot.slane %v1792_v53, 4  ;;  %v1001_v2 = vrot.slane %v1795_v57, 4 }
 0x179   : > { %v1798_v58 = vpop.trf.xlu2 }
 0x17a   : > { %v1799_v59 = vunpack.i.l.bf16 %v1798_v58  ;;  %v1802_v1 = vunpack.i.h.bf16 %v1798_v58  ;;  %v1926_v58 = vmov -inf  }
 0x17b   : > { %284 = vst.msk [vmem:[#allocation2 + $0x8] sm:$0xff] %vm282_vm2, %v1926_v58 }
 0x17c   : > { %v1014_v3 = vsel %vm321_vm0, %v1013_v61, %v1799_v59  ;;  %v1019_v11 = vrot.slane %v1802_v1, 4  ;;  %283 = vst.msk [vmem:[#allocation2] sm:$0xff] %vm282_vm2, %v1926_v58 }
 0x17d   : > { %v1805_v4 = vpop.trf.xlu0  ;;  %v1018_v12 = vperm.slane %v1014_v3, %v2015_v22  ;;  %285 = vst.msk [vmem:[#allocation2 + $0x10] sm:$0xff] %vm282_vm2, %v1926_v58  ;;  %v1927_v3 = vmov 0  }
 0x17e   : > { %v1809_v5 = vunpack.i.h.bf16 %v1805_v4  ;;  %v1806_v6 = vunpack.i.l.bf16 %v1805_v4  ;;  %286 = vst.msk [vmem:[#allocation2 + $0x18] sm:$0xff] %vm282_vm2, %v1926_v58  ;;  %1819 = vset.pattern.permute.xlu2 %v1927_v3  ;;  %1817 = vset.pattern.permute.xlu1 %v1927_v3  ;;  %v1928_v4 = vmov 0.0  }
 0x17f   : > { %v1039_v31 = vrot.slane %v1018_v12, 4  ;;  %1818 = vset.pattern.permute.xlu0 %v1927_v3  ;;  %288 = vst.msk [vmem:[#allocation3 + $0x8] sm:$0xff] %vm282_vm2, %v1928_v4 }
 0x180   : > { %v1007_v13 = vrot.slane %v1809_v5, 4  ;;  %v1002_v14 = vsel %vm321_vm0, %v1001_v2, %v1806_v6  ;;  %v1812_v15 = vpop.trf.xlu1  ;;  %287 = vst.msk [vmem:[#allocation3] sm:$0xff] %vm282_vm2, %v1928_v4 }
 0x181   : > { %v1006_v16 = vperm.slane %v1002_v14, %v2015_v22  ;;  %v1816_v17 = vunpack.i.h.bf16 %v1812_v15  ;;  %v1813_v18 = vunpack.i.l.bf16 %v1812_v15  ;;  %289 = vst.msk [vmem:[#allocation3 + $0x10] sm:$0xff] %vm282_vm2, %v1928_v4 }
 0x182   : > { %290 = vst.msk [vmem:[#allocation3 + $0x18] sm:$0xff] %vm282_vm2, %v1928_v4  ;;  %v2135_v5 = vld [vmem:[#allocation2 + $0x8] sm:$0xff] }
 0x183   : > { %v1008_v21 = vsel %vm321_vm0, %v1007_v13, %v1816_v17  ;;  %v1027_v23 = vrot.slane %v1006_v16, 4  ;;  %v1020_v24 = vsel %vm321_vm0, %v1019_v11, %v1813_v18  ;;  %292 = vst.msk [vmem:[#allocation4] sm:$0xff] %vm291_vm1, %v1928_v4  ;;  %v2165_v17 = vld [vmem:[#allocation2] sm:$0xff] }
 0x184   : > { %v1012_v25 = vperm.slane %v1008_v21, %v2015_v22  ;;  %v1024_v30 = vperm.slane %v1020_v24, %v2015_v22  ;;  %293 = vst.msk [vmem:[#allocation4 + $0x8] sm:$0xff] %vm291_vm1, %v1928_v4  ;;  %v2147_v10 = vld [vmem:[#allocation2 + $0x10] sm:$0xff]  ;;  %v315_v21 = vld [vmem:[%s276_s9 + $0xc] sm:$0xf]  ;;  %v313_v24 = vld [vmem:[%s276_s9 + $0x4] sm:$0xf] }
 0x185   : > { %294 = vst.msk [vmem:[#allocation4 + $0x10] sm:$0xff] %vm291_vm1, %v1928_v4  ;;  %v2140_v8 = vld [vmem:[#allocation2 + $0x18] sm:$0xff] }
 0x186   : > { %v1028_v32 = vsel %vm321_vm0, %v1012_v25, %v1027_v23  ;;  %v1025_v35 = vrot.slane %v1012_v25, 4  ;;  %v1040_v36 = vsel %vm321_vm0, %v1024_v30, %v1039_v31  ;;  %v1037_v37 = vrot.slane %v1024_v30, 4  ;;  %295 = vst.msk [vmem:[#allocation4 + $0x18] sm:$0xff] %vm291_vm1, %v1928_v4  ;;  %v314_v25 = vld [vmem:[%s276_s9 + $0x8] sm:$0xf] }
 0x187   : > { %v1036_v29 = vperm.slane %v1028_v32, %v2019_v27  ;;  %v1048_v39 = vperm.slane %v1040_v36, %v2019_v27  ;;  %v1277_v23 = vrot.slane %v315_v21, 4  ;;  %v1271_v28 = vrot.slane %v314_v25, 4  ;;  %v312_v32 = vld [vmem:[%s276_s9] sm:$0xf]  ;;  %s1864_s9 = scalar_lea.hbm %s2276_s3, 16 }
 0x188   : > { %v1026_v40 = vsel %vm321_vm0, %v1025_v35, %v1006_v16  ;;  %v1038_v44 = vsel %vm321_vm0, %v1037_v37, %v1018_v12  ;;  %v1289_v31 = vrot.slane %v319_v26, 4  ;;  %v1283_v36 = vrot.slane %v318_v34, 4  ;;  %p1866_p2 = scmp.lt.s32.totalorder %s1864_s9, %s1860_s7 }
 0x189   : > { %v1055_v42 = vrot.slane %v1036_v29, 4  ;;  %v1032_v43 = vperm.slane %v1026_v40, %v2019_v27  ;;  %v1053_v46 = vrot.slane %v1048_v39, 4  ;;  %v1044_v48 = vperm.slane %v1038_v44, %v2019_v27 }
 0x18a   : > { %v1278_v30 = vsel %vm321_vm0, %v1277_v23, %v313_v24  ;;  %v1290_v37 = vsel %vm321_vm0, %v1289_v31, %v317_v33  ;;  %p1867_p3 = por %p1866_p2, %p1865_p1 }
 0x18b   : > { %v1056_v49 = vsel %vm321_vm0, %v1048_v39, %v1055_v42  ;;  %v1051_v51 = vrot.slane %v1032_v43, 4  ;;  %v1054_v52 = vsel %vm321_vm0, %v1053_v46, %v1036_v29  ;;  %v1049_v53 = vrot.slane %v1044_v48, 4 }
 0x18c   : > { %1145 = vmatpush.msra.mxu3 %v1056_v49  ;;  %1122 = vmatpush.msra.mxu2 %v1054_v52  ;;  %v1282_v35 = vperm.slane %v1278_v30, %v2015_v22  ;;  %v1272_v29 = vsel %vm321_vm0, %v1271_v28, %v312_v32  ;;  %v1294_v40 = vperm.slane %v1290_v37, %v2015_v22  ;;  %p1868_p5 = pnand %p1867_p3, %p1863_p0 }
 0x18d   : > { %1686 = vmatmul.msk.f32.vlgmr.msra.gmra.mxu3 %vm291_vm1, %v376_v47  ;;  %v1052_v55 = vsel %vm321_vm0, %v1044_v48, %v1051_v51  ;;  %1685 = vmatmul.msk.f32.vlgmr.msra.gmra.mxu2 %vm291_vm1, %v374_v50  ;;  %v1050_v57 = vsel %vm321_vm0, %v1049_v53, %v1032_v43  ;;  %v1276_v39 = vperm.slane %v1272_v29, %v2015_v22 }
 0x18e   : > { %1099 = vmatpush.msra.mxu1 %v1052_v55  ;;  %1076 = vmatpush.msra.mxu0 %v1050_v57  ;;  %v1295_v41 = vrot.slane %v1282_v35, 4  ;;  %v1284_v42 = vsel %vm321_vm0, %v1283_v36, %v316_v38  ;;  %v1307_v45 = vrot.slane %v1294_v40, 4 }
 0x18f   : > { %1684 = vmatmul.msk.f32.vlgmr.msra.gmra.mxu1 %vm291_vm1, %v372_v54  ;;  %1683 = vmatmul.msk.f32.vlgmr.msra.gmra.mxu0 %vm291_vm1, %v370_v56  ;;  %v1288_v43 = vperm.slane %v1284_v42, %v2015_v22  ;;  %v1297_v53 = vrot.slane %v1276_v39, 4 }
 0x190   : > { %v1296_v44 = vsel %vm321_vm0, %v1295_v41, %v1276_v39 }
 0x191   : > { %v1302_v46 = vperm.slane %v1296_v44, %v2019_v27  ;;  %v1308_v47 = vsel %vm321_vm0, %v1307_v45, %v1288_v43  ;;  %v1309_v54 = vrot.slane %v1288_v43, 4  ;;  %v1298_v22 = vsel %vm321_vm0, %v1282_v35, %v1297_v53  ;;  %v1216_v43 = vld [vmem:[#allocation3 + $0x10] sm:$0xff] }
 0x192   : > { %v1314_v48 = vperm.slane %v1308_v47, %v2019_v27  ;;  %v1306_v57 = vperm.slane %v1298_v22, %v2019_v27 }
 0x193   : > { %v1321_v49 = vrot.slane %v1302_v46, 4  ;;  %v1310_v56 = vsel %vm321_vm0, %v1294_v40, %v1309_v54 }
 0x194   : > { %v1318_v58 = vperm.slane %v1310_v56, %v2019_v27 }
 0x195   : > { %v1322_v50 = vsel %vm321_vm0, %v1314_v48, %v1321_v49 }
 0x196   : > { %1368 = vmatpush.msrb.mxu1 %v1322_v50 }
 0x20c   : > { %v2111_v59 = vpop.f32.mrf.mxu1  ;;  %v2123_v1 = vpop.f32.mrf.mxu0 }
 0x20d   : > { %v1157_v60 = vsel %vm291_vm1, %v2111_v59, -inf  ;;  %v1154_v2 = vsel %vm291_vm1, %v2123_v1, -inf }
 0x20e   : > { %1158 = vmax.xlane.f32.xlu1 %v1157_v60  ;;  %v1323_v60 = vrot.slane %v1318_v58, 4 }
 0x210   : > { %v2115_v61 = vpop.f32.mrf.mxu3  ;;  %v2117_v62 = vpop.f32.mrf.mxu2 }
 0x211   : > { %v1163_v63 = vsel %vm291_vm1, %v2115_v61, -inf  ;;  %v1160_v0 = vsel %vm291_vm1, %v2117_v62, -inf }
 0x212   : > { %1164 = vmax.xlane.f32.xlu0 %v1163_v63  ;;  %1161 = vmax.xlane.f32.xlu2 %v1160_v0  ;;  %v1325_v63 = vrot.slane %v1306_v57, 4  ;;  %v1324_v0 = vsel %vm321_vm0, %v1323_v60, %v1306_v57 }
 0x213   : > { %1391 = vmatpush.msrb.mxu2 %v1324_v0  ;;  %v1246_v0 = vld [vmem:[#allocation4 + $0x18] sm:$0xff] }
 0x21a   : > { %1155 = vmax.xlane.f32.xlu2 %v1154_v2  ;;  %v1326_v2 = vsel %vm321_vm0, %v1318_v58, %v1325_v63 }
 0x21b   : > { %1414 = vmatpush.msrb.mxu3 %v1326_v2 }
 0x281   : > { %v1159_v6 = vpop.xlane.xlu1 %1158 }
 0x282   : > { %v2138_v7 = vmax.f32 %v2135_v5, %v1159_v6 }
 0x284   : > { %v1171_v9 = vsub.f32 %v2135_v5, %v2138_v7  ;;  %1428 = vst.msk [vmem:[#allocation2 + $0x8] sm:$0xff] %vm282_vm2, %v2138_v7  ;;  %1189 = vperm.xlu2 %1819, %v2138_v7  }
 0x285   : > { %v1165_v11 = vpop.xlane.xlu0 %1164  ;;  %v1162_v13 = vpop.xlane.xlu2 %1161 }
 0x286   : > { %v2150_v12 = vmax.f32 %v2140_v8, %v1165_v11  ;;  %v2153_v14 = vmax.f32 %v2147_v10, %v1162_v13  ;;  %v1176_v33 = vmul.f32 1.442695, %v1171_v9 }
 0x288   : > { %v1173_v15 = vsub.f32 %v2140_v8, %v2150_v12  ;;  %1430 = vst.msk [vmem:[#allocation2 + $0x18] sm:$0xff] %vm282_vm2, %v2150_v12  ;;  %1199 = vperm.xlu0 %1818, %v2150_v12   ;;  %v1172_v16 = vsub.f32 %v2147_v10, %v2153_v14  ;;  %1194 = vperm.xlu1 %1817, %v2153_v14   ;;  %v1215_v8 = vld [vmem:[#allocation3 + $0x8] sm:$0xff] }
 0x289   : > { %1429 = vst.msk [vmem:[#allocation2 + $0x10] sm:$0xff] %vm282_vm2, %v2153_v14 }
 0x28a   : > { %v1178_v35 = vmul.f32 1.442695, %v1172_v16  ;;  %v1217_v16 = vld [vmem:[#allocation3 + $0x18] sm:$0xff] }
 0x28d   : > { %v1156_v18 = vpop.xlane.xlu2 %1155 }
 0x28e   : > { %v2168_v19 = vmax.f32 %v2165_v17, %v1156_v18 }
 0x290   : > { %v1170_v20 = vsub.f32 %v2165_v17, %v2168_v19  ;;  %1427 = vst.msk [vmem:[#allocation2] sm:$0xff] %vm282_vm2, %v2168_v19  ;;  %1184 = vperm.xlu1 %1817, %v2168_v19   ;;  %v1214_v19 = vld [vmem:[#allocation3] sm:$0xff] }
 0x292   : > { %v1174_v14 = vmul.f32 1.442695, %v1170_v20  ;;  %v1244_v20 = vld [vmem:[#allocation4 + $0x8] sm:$0xff] }
 0x2de   : > { %v1190_v51 = vpop.permute.xlu2 %1189 }
 0x2df   : > { %v1203_v52 = vsub.f32 %v2111_v59, %v1190_v51  ;;  %v1319_v59 = vrot.slane %v1314_v48, 4 }
 0x2e1   : > { %v1208_v55 = vmul.f32 1.442695, %v1203_v52  ;;  %v1320_v6 = vsel %vm321_vm0, %v1319_v59, %v1302_v46 }
 0x2e2   : > { %1345 = vmatpush.msrb.mxu0 %v1320_v6 }
 0x2e3   : > { %1820 = vpow2.f32 %v1208_v55 }
 0x2e9   : > { %v1821_v3 = vpop.eup %1820 }
 0x2ea   : > { %1688 = vmatmul.msk.f32.vlgmr.msrb.gmra.mxu1 %vm291_vm1, %v1821_v3  ;;  %v1225_v4 = vsel %vm291_vm1, %v1821_v3, 0.0 }
 0x2eb   : > { %1226 = vadd.xlane.f32.xlu1 %v1225_v4 }
 0x2fa   : > { %v1200_v27 = vpop.permute.xlu0 %1199  ;;  %v1195_v13 = vpop.permute.xlu1 %1194 }
 0x2fb   : > { %v1205_v11 = vsub.f32 %v2115_v61, %v1200_v27  ;;  %v1204_v18 = vsub.f32 %v2117_v62, %v1195_v13 }
 0x2fd   : > { %v1212_v21 = vmul.f32 1.442695, %v1205_v11  ;;  %v1210_v23 = vmul.f32 1.442695, %v1204_v18 }
 0x2ff   : > { %1822 = vpow2.f32 %v1212_v21 }
 0x300   : > { %1824 = vpow2.f32 %v1210_v23 }
 0x302   : > { %v1185_v24 = vpop.permute.xlu1 %1184 }
 0x303   : > { %v1202_v25 = vsub.f32 %v2123_v1, %v1185_v24  ;;  %v1180_v1 = vmul.f32 1.442695, %v1173_v15 }
 0x305   : > { %v1823_v26 = vpop.eup %1822  ;;  %v1206_v30 = vmul.f32 1.442695, %v1202_v25 }
 0x306   : > { %v1825_v28 = vpop.eup %1824  ;;  %1690 = vmatmul.msk.f32.vlgmr.msrb.gmra.mxu3 %vm291_vm1, %v1823_v26  ;;  %v1231_v31 = vsel %vm291_vm1, %v1823_v26, 0.0 }
 0x307   : > { %1689 = vmatmul.msk.f32.vlgmr.msrb.gmra.mxu2 %vm291_vm1, %v1825_v28  ;;  %1232 = vadd.xlane.f32.xlu0 %v1231_v31  ;;  %v1228_v61 = vsel %vm291_vm1, %v1825_v28, 0.0  ;;  %1826 = vpow2.f32 %v1206_v30 }
 0x308   : > { %1229 = vadd.xlane.f32.xlu2 %v1228_v61  ;;  %1828 = vpow2.f32 %v1180_v1 }
 0x309   : > { %1830 = vpow2.f32 %v1176_v33 }
 0x30a   : > { %1832 = vpow2.f32 %v1178_v35 }
 0x30d   : > { %v1827_v62 = vpop.eup %1826 }
 0x30e   : > { %1687 = vmatmul.msk.f32.vlgmr.msrb.gmra.mxu0 %vm291_vm1, %v1827_v62  ;;  %v1222_v32 = vsel %vm291_vm1, %v1827_v62, 0.0  ;;  %v1829_v34 = vpop.eup %1828 }
 0x30f   : > { %1223 = vadd.xlane.f32.xlu1 %v1222_v32  ;;  %v1831_v29 = vpop.eup %1830  ;;  %v1221_v45 = vmul.f32 %v1829_v34, %v1217_v16 }
 0x310   : > { %v1833_v36 = vpop.eup %1832  ;;  %v1219_v12 = vmul.f32 %v1831_v29, %v1215_v8 }
 0x311   : > { %v1220_v48 = vmul.f32 %v1833_v36, %v1216_v43 }
 0x31b   : > { %1264 = vperm.xlu0 %1818, %v1829_v34  }
 0x320   : > { %1254 = vperm.xlu2 %1819, %v1831_v29  }
 0x328   : > { %1259 = vperm.xlu1 %1817, %v1833_v36  }
 0x35e   : > { %v1227_v15 = vpop.xlane.xlu1 %1226 }
 0x35f   : > { %v1235_v37 = vadd.f32 %v1227_v15, %v1219_v12  ;;  %v1245_v15 = vld [vmem:[#allocation4 + $0x10] sm:$0xff] }
 0x361   : > { %1240 = vst.msk [vmem:[#allocation3 + $0x8] sm:$0xff] %vm282_vm2, %v1235_v37 }
 0x367   : > { %v1370_v57 = vpop.f32.mrf.mxu1 }
 0x368   : > { %v1435_v5 = vld [vmem:[#allocation3 + $0x8] sm:$0xff] }
 0x369   : > { %1834 = vrcp.f32 %v1435_v5  ;;  %v1463_v39 = vand.u32 2147483648, %v1435_v5  ;;  %v1461_v10 = vand.u32 2147483647, %v1435_v5  ;;  %vm1457_vm4 = vweird.f32 %v1435_v5 }
 0x36a   : > { %1836 = vpow2.f32 %v1174_v14 }
 0x36b   : > { %v1464_v42 = vor.u32 1.1754944e-38, %v1463_v39  ;;  %vm1462_vm6 = vcmp.eq.f32.partialorder %v1461_v10, 8.507059e+37 }
 0x36f   : > { %v1835_v7 = vpop.eup %1834 }
 0x370   : > { %v1453_v9 = vmul.f32 %v1835_v7, %v1435_v5  ;;  %vm1458_vm3 = vweird.f32 %v1835_v7  ;;  %v2226_v17 = vpop.eup %1836 }
 0x371   : > { %vm1459_vm5 = vmor %vm1457_vm4, %vm1458_vm3  ;;  %v1218_v52 = vmul.f32 %v2226_v17, %v1214_v19  ;;  %vm1527_vm4 = vcmask 130112  }
 0x372   : > { %v1454_v38 = vsub.f32 1.0, %v1453_v9 }
 0x374   : > { %v1455_v40 = vmul.f32 %v1835_v7, %v1454_v38 }
 0x376   : > { %v1456_v41 = vadd.f32 %v1835_v7, %v1455_v40 }
 0x378   : > { %v1460_v44 = vsel %vm1459_vm5, %v1835_v7, %v1456_v41  ;;  %vm1533_vm5 = vcmask 195712  }
 0x379   : > { %v1465_v46 = vsel %vm1462_vm6, %v1464_v42, %v1460_v44  ;;  %vm1539_vm6 = vcmask 261312  }
 0x37a   : > { %v1233_v47 = vpop.xlane.xlu0 %1232  ;;  %1505 = vperm.xlu2 %1819, %v1465_v46  }
 0x37b   : > { %v1237_v49 = vadd.f32 %v1233_v47, %v1221_v45  ;;  %v1230_v50 = vpop.xlane.xlu2 %1229 }
 0x37c   : > { %v1236_v51 = vadd.f32 %v1230_v50, %v1220_v48  ;;  %v1243_v50 = vld [vmem:[#allocation4] sm:$0xff] }
 0x37d   : > { %1242 = vst.msk [vmem:[#allocation3 + $0x18] sm:$0xff] %vm282_vm2, %v1237_v49 }
 0x37e   : > { %1241 = vst.msk [vmem:[#allocation3 + $0x10] sm:$0xff] %vm282_vm2, %v1236_v51 }
 0x382   : > { %v1224_v53 = vpop.xlane.xlu1 %1223 }
 0x383   : > { %v1255_v54 = vpop.permute.xlu2 %1254  ;;  %v1234_v55 = vadd.f32 %v1224_v53, %v1218_v52 }
 0x384   : > { %v1268_v22 = vmul.f32 %v1255_v54, %v1244_v20  ;;  %v1437_v56 = vld [vmem:[#allocation3 + $0x18] sm:$0xff] }
 0x385   : > { %1838 = vrcp.f32 %v1437_v56  ;;  %v1436_v58 = vld [vmem:[#allocation3 + $0x10] sm:$0xff]  ;;  %1239 = vst.msk [vmem:[#allocation3] sm:$0xff] %vm282_vm2, %v1234_v55  ;;  %v1489_v18 = vand.u32 2147483647, %v1437_v56  ;;  %v1491_v21 = vand.u32 2147483648, %v1437_v56  ;;  %vm1485_vm9 = vweird.f32 %v1437_v56 }
 0x386   : > { %v1420_v60 = vadd.f32 %v1370_v57, %v1268_v22  ;;  %1840 = vrcp.f32 %v1436_v58  ;;  %v1477_v26 = vand.u32 2147483648, %v1436_v58  ;;  %v1475_v30 = vand.u32 2147483647, %v1436_v58 }
 0x387   : > { %v1492_v61 = vor.u32 1.1754944e-38, %v1491_v21  ;;  %vm1471_vm11 = vweird.f32 %v1436_v58  ;;  %vm1490_vm12 = vcmp.eq.f32.partialorder %v1489_v18, 8.507059e+37 }
 0x388   : > { %1424 = vst.msk [vmem:[#allocation4 + $0x8] sm:$0xff] %vm291_vm1, %v1420_v60  ;;  %v1478_v33 = vor.u32 1.1754944e-38, %v1477_v26  ;;  %vm1476_vm14 = vcmp.eq.f32.partialorder %v1475_v30, 8.507059e+37 }
 0x389   : > { %v1416_v13 = vpop.f32.mrf.mxu3 }
 0x38a   : > { %v1393_v40 = vpop.f32.mrf.mxu2 }
 0x38b   : > { %v1839_v63 = vpop.eup %1838  ;;  %v1347_v19 = vpop.f32.mrf.mxu0 }
 0x38c   : > { %v1841_v2 = vpop.eup %1840  ;;  %v1481_v59 = vmul.f32 %v1839_v63, %v1437_v56  ;;  %v1434_v6 = vld [vmem:[#allocation3] sm:$0xff]  ;;  %vm1486_vm7 = vweird.f32 %v1839_v63 }
 0x38d   : > { %v1265_v3 = vpop.permute.xlu0 %1264  ;;  %v1467_v4 = vmul.f32 %v1841_v2, %v1436_v58  ;;  %1842 = vrcp.f32 %v1434_v6  ;;  %vm1472_vm8 = vweird.f32 %v1841_v2  ;;  %vm1487_vm10 = vmor %vm1485_vm9, %vm1486_vm7  ;;  %v1449_v12 = vand.u32 2147483648, %v1434_v6 }
 0x38e   : > { %v1270_v27 = vmul.f32 %v1265_v3, %v1246_v0  ;;  %v1482_v11 = vsub.f32 1.0, %v1481_v59  ;;  %vm1473_vm13 = vmor %vm1471_vm11, %vm1472_vm8  ;;  %v1447_v5 = vand.u32 2147483647, %v1434_v6  ;;  %vm1443_vm0 = vweird.f32 %v1434_v6 }
 0x38f   : > { %v1468_v23 = vsub.f32 1.0, %v1467_v4  ;;  %v1450_v39 = vor.u32 1.1754944e-38, %v1449_v12  ;;  %v1495_v41 = vld [vmem:[#allocation4 + $0x8] sm:$0xff] }
 0x390   : > { %v1422_v24 = vadd.f32 %v1416_v13, %v1270_v27  ;;  %v1483_v25 = vmul.f32 %v1839_v63, %v1482_v11  ;;  %vm1448_vm3 = vcmp.eq.f32.partialorder %v1447_v5, 8.507059e+37 }
 0x391   : > { %v1469_v28 = vmul.f32 %v1841_v2, %v1468_v23 }
 0x392   : > { %1426 = vst.msk [vmem:[#allocation4 + $0x18] sm:$0xff] %vm291_vm1, %v1422_v24  ;;  %v1484_v31 = vadd.f32 %v1839_v63, %v1483_v25 }
 0x393   : > { %v1470_v62 = vadd.f32 %v1841_v2, %v1469_v28  ;;  %v1843_v32 = vpop.eup %1842 }
 0x394   : > { %v1488_v1 = vsel %vm1487_vm10, %v1839_v63, %v1484_v31  ;;  %v1439_v29 = vmul.f32 %v1843_v32, %v1434_v6  ;;  %vm1444_vm15 = vweird.f32 %v1843_v32 }
 0x395   : > { %v1493_v34 = vsel %vm1490_vm12, %v1492_v61, %v1488_v1  ;;  %v1474_v35 = vsel %vm1473_vm13, %v1841_v2, %v1470_v62  ;;  %vm1445_vm2 = vmor %vm1443_vm0, %vm1444_vm15 }
 0x396   : > { %1515 = vperm.xlu2 %1819, %v1493_v34   ;;  %v1479_v36 = vsel %vm1476_vm14, %v1478_v33, %v1474_v35  ;;  %v1440_v8 = vsub.f32 1.0, %v1439_v29 }
 0x397   : > { %1510 = vperm.xlu1 %1817, %v1479_v36  }
 0x398   : > { %v1441_v37 = vmul.f32 %v1843_v32, %v1440_v8 }
 0x399   : > { %v1497_v44 = vld [vmem:[#allocation4 + $0x18] sm:$0xff] }
 0x39a   : > { %v1260_v7 = vpop.permute.xlu1 %1259  ;;  %v1442_v9 = vadd.f32 %v1843_v32, %v1441_v37 }
 0x39b   : > { %v1269_v38 = vmul.f32 %v1260_v7, %v1245_v15 }
 0x39c   : > { %v1446_v10 = vsel %vm1445_vm2, %v1843_v32, %v1442_v9 }
 0x39d   : > { %v1421_v14 = vadd.f32 %v1393_v40, %v1269_v38  ;;  %v1451_v16 = vsel %vm1448_vm3, %v1450_v39, %v1446_v10 }
 0x39e   : > { %1500 = vperm.xlu0 %1818, %v1451_v16  }
 0x39f   : > { %1249 = vperm.xlu1 %1817, %v2226_v17   ;;  %1425 = vst.msk [vmem:[#allocation4 + $0x10] sm:$0xff] %vm291_vm1, %v1421_v14 }
 0x3a6   : > { %v1496_v47 = vld [vmem:[#allocation4 + $0x10] sm:$0xff] }
 0x3d4   : > { %v1506_v42 = vpop.permute.xlu2 %1505 }
 0x3d5   : > { %v1519_v43 = vmul.f32 %v1506_v42, %v1495_v41 }
 0x3d7   : > { %1524 = vrot.lane.b32.xlu2 %v1519_v43, %s1929_s10 }
 0x3f0   : > { %v1516_v45 = vpop.permute.xlu2 %1515 }
 0x3f1   : > { %v1521_v46 = vmul.f32 %v1516_v45, %v1497_v44 }
 0x3f3   : > { %1536 = vrot.lane.b32.xlu0 %v1521_v46, %s1930_s11 }
 0x409   : > { %v1511_v48 = vpop.permute.xlu1 %1510 }
 0x40a   : > { %v1520_v49 = vmul.f32 %v1511_v48, %v1496_v47 }
 0x40c   : > { %1530 = vrot.lane.b32.xlu1 %v1520_v49, %s1931_s18 }
 0x410   : > { %v1501_v52 = vpop.permute.xlu0 %1500 }
 0x411   : > { %v1250_v51 = vpop.permute.xlu1 %1249 }
 0x412   : > { %v1267_v17 = vmul.f32 %v1250_v51, %v1243_v50 }
 0x414   : > { %v1419_v20 = vadd.f32 %v1347_v19, %v1267_v17 }
 0x416   : > { %1423 = vst.msk [vmem:[#allocation4] sm:$0xff] %vm291_vm1, %v1419_v20 }
 0x41d   : > { %v1494_v53 = vld [vmem:[#allocation4] sm:$0xff] }
 0x41e   : > { %v1518_v54 = vmul.f32 %v1501_v52, %v1494_v53 }
 0x420   : > { %1522 = vst.msk [vmem:[%s247_s23] sm:$0xff] %vm291_vm1, %v1518_v54 }
 0x431   : > { %v1525_v55 = vpop.permute.xlu2 %1524 }
 0x432   : > { %1528 = vst.msk [vmem:[%s247_s23] sm:$0xff] %vm1527_vm4, %v1525_v55 }
 0x465   : > { %v1537_v56 = vpop.permute.xlu0 %1536 }
 0x47e   : > { %v1531_v22 = vpop.permute.xlu1 %1530 }
 0x47f   : > { %1534 = vst.msk [vmem:[%s247_s23] sm:$0xff] %vm1533_vm5, %v1531_v22 }
 0x480   : > { %1540 = vst.msk [vmem:[%s247_s23] sm:$0xff] %vm1539_vm6, %v1537_v56 }
 0x481   : > { %1871 = shalt.err (!%p1868_p5)
}
 0x482   : > { %1698 = dma.vmem_to_hbm [thread:$0]  (%p1992_p4), %s1556_s30, 128, %s1558_s4, %s1542_s5  }
 0x483 PF: > { %p1704_p6 = scmp.ge.s32.totalorder %s1922_s17, 2  ;;  %s1569_s18 = sand.u32 1, %s1902_s12  }
 0x484   : > { %s1570_s19 = scalar_lea.sflag [#allocation6], %s1569_s18 }
 0x485   : > { %p1701_p7 = pnand %p1704_p6, %p1999_p8 }
 0x487   : > { %p1702_p9 = pneg %p1701_p7 }
 0x489   : > { %1897 = dma.done.wait (%p1702_p9), %s1570_s19, 128  }
 0x48a   : > { %1899 = vsyncadd (%p1702_p9), %s1570_s19, 4294967168  ;;  %s16_s17 = sadd.s32 1, %s1922_s17   ;;  %s2279_s12 = smov %s1906_s13 }
 0x48b   : > { %p13_p10 = scmp.ge.s32.totalorder %s16_s17, 4   ;;  %s2280_s13 = smov %s1910_s14 }
 0x48c   : > { %s2281_s14 = smov %s2005_s25  ;;  %s2282_s15 = smov %s1918_s16 }
 0x48d   : > { %s2283_s16 = smov %s2285_s20  ;;  %15 = sbr.rel (!%p13_p10) target bundleno = 4 (0x4), region = 81 }
 0x492   :  { %1576 = vsyncpa [#allocation6], 1 }
 0x493   :  { %1578 = vsyncpa [#allocation6 + $0x1], 1 }

</bundles_post_ra>
